<compile_context>
chip_gen: v5e
topology: v5e:2x2
jax: 0.10.0
libtpu: 0.0.40
codegen_flags: <defaults>
</compile_context>

<pallas_src>
import functools

import jax
import jax.numpy as jnp
from jax.experimental import pallas as pl
from jax.experimental.pallas import tpu as pltpu

_LANE = 128        # pad num_actions up to a full lane slab -> unmasked vst stores
_MAX_TB = 128      # cap batch tile: (128,128) f32 softmax intermediates fit the vreg file
_NEG_BIAS = -1e30  # bias padding: exp(pad - max) underflows to exactly 0 in f32


def policy_kernel(s_ref, w1_ref, b1_ref, w2_ref, b2_ref, out_ref):
    # s_ref : (TB, 1)           int32  VMEM  state indices for this batch tile
    # w1_ref: (num_states, k)   f32    VMEM  (tiny; same block every grid step)
    # b1_ref: (1, k)            f32
    # w2_ref: (k, A_pad)        f32    action dim zero-padded to 128 lanes
    # b2_ref: (1, A_pad)        f32    padded lanes carry -1e30
    # out   : (TB, A_pad)       f32    softmax probabilities (padded lanes -> 0)
    num_states = w1_ref.shape[0]
    tb = out_ref.shape[0]

    # In-kernel clamp: torch one_hot errors on out-of-range; we never index OOB.
    s = jnp.clip(s_ref[...], 0, num_states - 1)                          # (TB, 1)

    # fc1: build one_hot(s) in-register (VPU compare) and do one MXU matmul,
    # instead of a serialized scalar-driven row gather.
    iota = jax.lax.broadcasted_iota(jnp.int32, (tb, num_states), 1)       # (TB, NS)
    onehot = (iota == s).astype(jnp.float32)                              # (TB, NS)
    x1 = jnp.dot(onehot, w1_ref[...], preferred_element_type=jnp.float32) + b1_ref[...]
    x2 = jnp.maximum(x1, 0.0)                                             # ReLU

    # fc2: (TB, k) @ (k, A_pad)
    x3 = jnp.dot(x2, w2_ref[...], preferred_element_type=jnp.float32) + b2_ref[...]

    # Numerically stable softmax over the lane-dense action dim. Exact divide:
    # the (TB, 1) denominator makes it essentially free and keeps rows summing
    # to 1 at f32 precision (important for categorical sampling downstream).
    m = jnp.max(x3, axis=-1, keepdims=True)
    e = jnp.exp(x3 - m)                                   # padded lanes: exp(-1e30 - m) == 0
    out_ref[...] = e / jnp.sum(e, axis=-1, keepdims=True)


def prepare_params(w1, b1, w2, b2):
    """One-time weight preparation, hoisted out of the per-call forward."""
    num_states, k = w1.shape
    num_actions = w2.shape[1]
    a_pad = ((num_actions + _LANE - 1) // _LANE) * _LANE

    w1_p = w1.astype(jnp.float32)
    b1_2d = b1.reshape(1, k).astype(jnp.float32)
    w2_p = jnp.pad(w2.astype(jnp.float32), ((0, 0), (0, a_pad - num_actions)))
    b2_p = jnp.pad(b2.reshape(1, num_actions).astype(jnp.float32),
                   ((0, 0), (0, a_pad - num_actions)),
                   constant_values=_NEG_BIAS)
    return w1_p, b1_2d, w2_p, b2_p, num_actions


@functools.partial(jax.jit, static_argnames=("num_actions",))
def policy_forward(s_idx, w1, b1_2d, w2_p, b2_p, *, num_actions):
    """s_idx: (B,) integer state indices. Returns (B, num_actions) f32 probabilities."""
    B = s_idx.shape[0]
    num_states, k = w1.shape
    a_pad = w2_p.shape[1]

    # Batch tile: sublane-aligned, capped at 128 (softmax intermediates = 32 vregs).
    tb = min(((B + 7) // 8) * 8, _MAX_TB)
    b_pad = ((B + tb - 1) // tb) * tb

    # Pad rows (index 0 after in-kernel clamp; results discarded by the slice below)
    # and present indices as a (b_pad, 1) int32 column for the VMEM block.
    s2d = jnp.pad(s_idx.astype(jnp.int32), (0, b_pad - B)).reshape(b_pad, 1)

    out_padded = pl.pallas_call(
        policy_kernel,
        out_shape=jax.ShapeDtypeStruct((b_pad, a_pad), jnp.float32),
        grid=(b_pad // tb,),
        in_specs=[
            pl.BlockSpec((tb, 1), lambda i: (i, 0)),            # state indices
            pl.BlockSpec((num_states, k), lambda i: (0, 0)),    # W1 resident
            pl.BlockSpec((1, k), lambda i: (0, 0)),             # b1
            pl.BlockSpec((k, a_pad), lambda i: (0, 0)),         # W2 (lane-padded)
            pl.BlockSpec((1, a_pad), lambda i: (0, 0)),         # b2 (lane-padded)
        ],
        out_specs=pl.BlockSpec((tb, a_pad), lambda i: (i, 0)),
        compiler_params=pltpu.CompilerParams(
            # batch tiles are independent -> shard across TensorCores on v7x
            # (only pays off once B >= 2*tb; single-step grids run on one core)
            dimension_semantics=("parallel",),
        ),
    )(s2d, w1, b1_2d, w2_p, b2_p)

    return out_padded[:B, :num_actions]


def init_params(key, num_states, k, num_actions):
    """Deterministic init mirroring nn.Linear's uniform(-1/sqrt(fan_in), 1/sqrt(fan_in))."""
    k1, k2, k3, k4 = jax.random.split(key, 4)
    bound1 = 1.0 / jnp.sqrt(num_states)
    bound2 = 1.0 / jnp.sqrt(k)
    # stored as (in_features, out_features)
    w1 = jax.random.uniform(k1, (num_states, k), jnp.float32, -bound1, bound1)
    b1 = jax.random.uniform(k2, (k,), jnp.float32, -bound1, bound1)
    w2 = jax.random.uniform(k3, (k, num_actions), jnp.float32, -bound2, bound2)
    b2 = jax.random.uniform(k4, (num_actions,), jnp.float32, -bound2, bound2)
    return w1, b1, w2, b2


if __name__ == "__main__":
    num_states = 16
    k = 32
    num_actions = 8
    batch = 2

    key = jax.random.PRNGKey(0)
    pkey, skey = jax.random.split(key)
    w1, b1, w2, b2 = init_params(pkey, num_states, k, num_actions)
    s_idx = jax.random.randint(skey, (batch,), 0, num_states, dtype=jnp.int32)

    # One-time weight prep (kept out of the per-call forward).
    w1_p, b1_2d, w2_p, b2_p, na = prepare_params(w1, b1, w2, b2)

    probs = policy_forward(s_idx, w1_p, b1_2d, w2_p, b2_p, num_actions=na)
    probs = jax.block_until_ready(probs)

    # reference check in plain JAX
    onehot = jax.nn.one_hot(s_idx, num_states, dtype=jnp.float32)
    ref = jax.nn.softmax(jnp.maximum(onehot @ w1 + b1, 0.0) @ w2 + b2, axis=-1)
    assert probs.shape == (batch, num_actions)
    assert jnp.allclose(probs, ref, atol=1e-5), "mismatch vs reference"
    assert jnp.allclose(jnp.sum(probs, axis=-1), 1.0, atol=1e-5)

    print("KERNEL_OK")
</pallas_src>

<mosaic_0001>
module attributes {stable_mosaic.version = 11 : i64} {
  func.func @policy_kernel(%arg0: i32, %arg1: memref<8x1xi32, #tpu.memory_space<vmem>>, %arg2: memref<16x32xf32, #tpu.memory_space<vmem>>, %arg3: memref<1x32xf32, #tpu.memory_space<vmem>>, %arg4: memref<32x128xf32, #tpu.memory_space<vmem>>, %arg5: memref<1x128xf32, #tpu.memory_space<vmem>>, %arg6: memref<8x128xf32, #tpu.memory_space<vmem>>) attributes {dimension_semantics = [#tpu.dimension_semantics<parallel>], iteration_bounds = array<i64: 1>, scalar_prefetch = 0 : i64, scratch_operands = 0 : i64, tpu.core_type = #tpu.core_type<tc>, window_params = [{transform_indices = @transform_0, window_bounds = array<i64: 8, 1>}, {pipeline_mode = #tpu.pipeline_mode<synchronous>, transform_indices = @transform_1, window_bounds = array<i64: 16, 32>}, {pipeline_mode = #tpu.pipeline_mode<synchronous>, transform_indices = @transform_2, window_bounds = array<i64: 1, 32>}, {pipeline_mode = #tpu.pipeline_mode<synchronous>, transform_indices = @transform_3, window_bounds = array<i64: 32, 128>}, {pipeline_mode = #tpu.pipeline_mode<synchronous>, transform_indices = @transform_4, window_bounds = array<i64: 1, 128>}, {transform_indices = @transform_5, window_bounds = array<i64: 8, 128>}]} {
    %c0 = arith.constant 0 : index
    %c0_0 = arith.constant 0 : index
    %0 = vector.load %arg1[%c0, %c0_0] : memref<8x1xi32, #tpu.memory_space<vmem>>, vector<8x1xi32>
    %c0_i32 = arith.constant 0 : i32
    %c15_i32 = arith.constant 15 : i32
    %1 = vector.broadcast %c0_i32 : i32 to vector<8x1xi32>
    %2 = arith.maxsi %1, %0 : vector<8x1xi32>
    %3 = vector.broadcast %c15_i32 : i32 to vector<8x1xi32>
    %4 = arith.minsi %3, %2 : vector<8x1xi32>
    %5 = tpu.iota {dimensions = array<i32: 1>} : vector<8x16xi32>
    %6 = vector.broadcast %4 : vector<8x1xi32> to vector<8x16xi32>
    %7 = arith.cmpi eq, %5, %6 : vector<8x16xi32>
    %8 = arith.extui %7 : vector<8x16xi1> to vector<8x16xi32>
    %9 = arith.sitofp %8 : vector<8x16xi32> to vector<8x16xf32>
    %c0_1 = arith.constant 0 : index
    %c0_2 = arith.constant 0 : index
    %10 = vector.load %arg2[%c0_1, %c0_2] : memref<16x32xf32, #tpu.memory_space<vmem>>, vector<16x32xf32>
    %cst = arith.constant dense<0.000000e+00> : vector<8x32xf32>
    %11 = tpu.matmul %9, %10, %cst {dimension_numbers = #tpu.dot_dimension_numbers<[1], [0], [0], [1], [0, 0, 1, 1], [], []>} : vector<8x16xf32>, vector<16x32xf32>, vector<8x32xf32> -> vector<8x32xf32>
    %c0_3 = arith.constant 0 : index
    %c0_4 = arith.constant 0 : index
    %12 = vector.load %arg3[%c0_3, %c0_4] : memref<1x32xf32, #tpu.memory_space<vmem>>, vector<1x32xf32>
    %13 = vector.broadcast %12 : vector<1x32xf32> to vector<8x32xf32>
    %14 = arith.addf %11, %13 : vector<8x32xf32>
    %cst_5 = arith.constant 0.000000e+00 : f32
    %15 = vector.broadcast %cst_5 : f32 to vector<8x32xf32>
    %16 = arith.maximumf %14, %15 : vector<8x32xf32>
    %c0_6 = arith.constant 0 : index
    %c0_7 = arith.constant 0 : index
    %17 = vector.load %arg4[%c0_6, %c0_7] : memref<32x128xf32, #tpu.memory_space<vmem>>, vector<32x128xf32>
    %cst_8 = arith.constant dense<0.000000e+00> : vector<8x128xf32>
    %18 = tpu.matmul %16, %17, %cst_8 {dimension_numbers = #tpu.dot_dimension_numbers<[1], [0], [0], [1], [0, 0, 1, 1], [], []>} : vector<8x32xf32>, vector<32x128xf32>, vector<8x128xf32> -> vector<8x128xf32>
    %c0_9 = arith.constant 0 : index
    %c0_10 = arith.constant 0 : index
    %19 = vector.load %arg5[%c0_9, %c0_10] : memref<1x128xf32, #tpu.memory_space<vmem>>, vector<1x128xf32>
    %20 = vector.broadcast %19 : vector<1x128xf32> to vector<8x128xf32>
    %21 = arith.addf %18, %20 : vector<8x128xf32>
    %cst_11 = arith.constant dense<0xFF800000> : vector<8xf32>
    %22 = vector.multi_reduction <maximumf>, %21, %cst_11 [1] : vector<8x128xf32> to vector<8xf32>
    %23 = vector.shape_cast %22 : vector<8xf32> to vector<8x1xf32>
    %24 = vector.broadcast %23 : vector<8x1xf32> to vector<8x128xf32>
    %25 = arith.subf %21, %24 : vector<8x128xf32>
    %26 = math.exp %25 : vector<8x128xf32>
    %cst_12 = arith.constant dense<0.000000e+00> : vector<8xf32>
    %27 = vector.multi_reduction <add>, %26, %cst_12 [1] : vector<8x128xf32> to vector<8xf32>
    %28 = vector.shape_cast %27 : vector<8xf32> to vector<8x1xf32>
    %29 = vector.broadcast %28 : vector<8x1xf32> to vector<8x128xf32>
    %30 = arith.divf %26, %29 : vector<8x128xf32>
    %c0_13 = arith.constant 0 : index
    %c0_14 = arith.constant 0 : index
    %31 = vector.load %arg6[%c0_13, %c0_14] : memref<8x128xf32, #tpu.memory_space<vmem>>, vector<8x128xf32>
    tpu.vector_store %arg6[%c0_13, %c0_14], %30 {strides = array<i32>} : memref<8x128xf32, #tpu.memory_space<vmem>>, vector<8x128xf32>,
    return
  }
  func.func @transform_0(%arg0: i32) -> (i32, i32) {
    %c0_i32 = arith.constant 0 : i32
    %c0_i32_0 = arith.constant 0 : i32
    return %arg0, %c0_i32 : i32, i32
  }
  func.func @transform_1(%arg0: i32) -> (i32, i32) {
    %c0_i32 = arith.constant 0 : i32
    %c0_i32_0 = arith.constant 0 : i32
    %c0_i32_1 = arith.constant 0 : i32
    return %c0_i32, %c0_i32_0 : i32, i32
  }
  func.func @transform_2(%arg0: i32) -> (i32, i32) {
    %c0_i32 = arith.constant 0 : i32
    %c0_i32_0 = arith.constant 0 : i32
    %c0_i32_1 = arith.constant 0 : i32
    return %c0_i32, %c0_i32_0 : i32, i32
  }
  func.func @transform_3(%arg0: i32) -> (i32, i32) {
    %c0_i32 = arith.constant 0 : i32
    %c0_i32_0 = arith.constant 0 : i32
    %c0_i32_1 = arith.constant 0 : i32
    return %c0_i32, %c0_i32_0 : i32, i32
  }
  func.func @transform_4(%arg0: i32) -> (i32, i32) {
    %c0_i32 = arith.constant 0 : i32
    %c0_i32_0 = arith.constant 0 : i32
    %c0_i32_1 = arith.constant 0 : i32
    return %c0_i32, %c0_i32_0 : i32, i32
  }
  func.func @transform_5(%arg0: i32) -> (i32, i32) {
    %c0_i32 = arith.constant 0 : i32
    %c0_i32_0 = arith.constant 0 : i32
    return %arg0, %c0_i32 : i32, i32
  }
}

</mosaic_0001>

<bundles_post_ra>
// kernel: policy_forward.1
= control target key start
LH: loop header
LB: loop body
LE: loop exit
PB: predicated region body
PF: predicated region fallthrough
CT: control target
= control target key end

     0   :  { %10 = vsyncpa [#allocation3], 0  ;;  %s279_s0 = inlined_call_operand.vmem [shape: s32[8,1], index: 0, kind: input, shape index: {}]   ;;  %s280_s1 = inlined_call_operand.hbm [shape: f32[16,32], index: 1, kind: input, shape index: {}]   ;;  %s281_s2 = inlined_call_operand.vmem [shape: f32[1,32], index: 2, kind: input, shape index: {}]   ;;  %s282_s3 = inlined_call_operand.hbm [shape: f32[32,128], index: 3, kind: input, shape index: {}]   ;;  %s283_s4 = inlined_call_operand.vmem [shape: f32[1,128], index: 4, kind: input, shape index: {}]   ;;  %s284_s5 = inlined_call_operand.vmem [shape: f32[8,128], index: 5, kind: output, shape index: {}]  }
   0x1   :  { %s18_s20 = sshll.u32 %s280_s1, 4  ;;  %s19_s20 = int_to_ptr.hbm [resolvable:$true] %s18_s20 }
   0x2   :  { %11 = vsyncpa [#allocation5], 0  ;;  %s225_s21 = smov [#allocation2]   ;;  %s33_s25 = sshll.u32 %s282_s3, 4  ;;  %s34_s25 = int_to_ptr.hbm [resolvable:$true] %s33_s25 }
   0x3   :  { %s20_s22 = sshll.u32 %s225_s21, 4  ;;  %s226_s26 = smov 128   ;;  %s21_s22 = int_to_ptr.vmem [resolvable:$true] %s20_s22 }
   0x4   :  { %s227_s27 = smov 8   ;;  %s228_s28 = smov [#allocation4]  }
   0x5   :  { %26 = dma.hbm_to_vmem [thread:$0]  %s19_s20, 256, %s21_s22, [#allocation3], %s226_s26, %s226_s26, %s227_s27  }
   0x6   :  { %s35_s29 = sshll.u32 %s228_s28, 4  ;;  %s36_s29 = int_to_ptr.vmem [resolvable:$true] %s35_s29 }
   0x7   :  { %41 = dma.hbm_to_vmem [thread:$0]  %s34_s25, 512, %s36_s29, [#allocation5], %s226_s26, %s226_s26, %s227_s27  }
   0x8   :  { %221 = dma.done.wait [#allocation3], 256  }
   0x9   :  { %222 = vsyncadd [#allocation3], 4294967040 }
   0xa   :  { %223 = dma.done.wait [#allocation5], 512  }
   0xb   :  { %224 = vsyncadd [#allocation5], 4294966784  ;;  %v229_v0 = vmov 0   ;;  %v52_v1 = vld [vmem:[%s279_s0] sm:$0xff]  ;;  %v66_v2 = vld [vmem:[#allocation2 + $0x8] sm:$0xff]  ;;  %v57_v7 = vlaneseq  ;;  %vm71_vm2 = vcmask 130048  }
   0xc   :  { %166 = vset.pattern.permute.xlu0 %v229_v0  ;;  %vm53_vm0 = vcmp.gt.s32.totalorder %v52_v1, 0  ;;  %89 = vmatpush.msra.mxu0 %v66_v2  ;;  %v65_v5 = vld [vmem:[#allocation2] sm:$0xff]  ;;  %v99_v6 = vld [vmem:[#allocation4 + $0x18] sm:$0xff]  ;;  %v230_v10 = vmov 0.0   ;;  %v97_v13 = vld [vmem:[#allocation4 + $0x8] sm:$0xff]  ;;  %vm104_vm4 = vcmask 261120  }
   0xd   :  { %v54_v3 = vsel %vm53_vm0, %v52_v1, 0  ;;  %120 = vmatpush.msra.mxu1 %v99_v6  ;;  %v58_v8 = vand.u32 127, %v57_v7  ;;  %v98_v12 = vld [vmem:[#allocation4 + $0x10] sm:$0xff]  ;;  %v96_v14 = vld [vmem:[#allocation4] sm:$0xff] }
   0xe   :  { %vm55_vm1 = vcmp.lt.s32.totalorder %v54_v3, 15  ;;  %90 = vmatpush.msra.mxu0 %v65_v5  ;;  %v167_v15 = vld [vmem:[%s281_s2] ss:$0 sm:$0xff] }
   0xf   :  { %v56_v4 = vsel %vm55_vm1, %v54_v3, 15  ;;  %121 = vmatpush.msra.mxu1 %v98_v12  ;;  %v168_v19 = vld [vmem:[%s283_s4] ss:$0 sm:$0xff] }
  0x10   :  { %60 = vperm.xlu0 %166, %v56_v4  }
  0x11   :  { %122 = vmatpush.msra.mxu1 %v97_v13 }
  0x13   :  { %123 = vmatpush.msra.mxu1 %v96_v14 }
  0x82   :  { %v61_v9 = vpop.permute.xlu0 %60 }
  0x83   :  { %vm62_vm3 = vcmp.eq.s32.totalorder %v58_v8, %v61_v9 }
  0x84   :  { %v157_v11 = vsel %vm62_vm3, 1.0, %v230_v10 }
  0x85   :  { %158 = vmatmul.msk.f32.vlgmr.msra.gmra.mxu0 %vm71_vm2, %v157_v11 }
 0x102   :  { %v92_v16 = vpop.f32.mrf.mxu0 }
 0x103   :  { %v93_v17 = vadd.f32 %v167_v15, %v92_v16 }
 0x105   :  { %v95_v18 = vmax.f32 %v93_v17, 0.0 }
 0x107   :  { %159 = vmatmul.msk.f32.vlgmr.msra.gmra.mxu1 %vm104_vm4, %v95_v18 }
 0x184   :  { %v125_v20 = vpop.f32.mrf.mxu1 }
 0x185   :  { %v126_v21 = vadd.f32 %v168_v19, %v125_v20 }
 0x187   :  { %128 = vmax.xlane.f32.xlu0 %v126_v21 }
 0x1fa   :  { %v129_v22 = vpop.xlane.xlu0 %128 }
 0x1fb   :  { %v130_v23 = vsub.f32 %v126_v21, %v129_v22 }
 0x1fd   :  { %v131_v24 = vmul.f32 1.442695, %v130_v23 }
 0x1ff   :  { %169 = vpow2.f32 %v131_v24 }
 0x205   :  { %v170_v25 = vpop.eup %169 }
 0x206   :  { %133 = vadd.xlane.f32.xlu1 %v170_v25 }
 0x279   :  { %v134_v26 = vpop.xlane.xlu1 %133 }
 0x27a   :  { %171 = vrcp.f32 %v134_v26  ;;  %v146_v30 = vand.u32 2147483648, %v134_v26  ;;  %v144_v32 = vand.u32 2147483647, %v134_v26  ;;  %vm140_vm6 = vweird.f32 %v134_v26 }
 0x27c   :  { %v147_v34 = vor.u32 1.1754944e-38, %v146_v30  ;;  %vm145_vm8 = vcmp.eq.f32.partialorder %v144_v32, 8.507059e+37 }
 0x280   :  { %v172_v27 = vpop.eup %171 }
 0x281   :  { %v136_v28 = vmul.f32 %v172_v27, %v134_v26  ;;  %vm141_vm5 = vweird.f32 %v172_v27 }
 0x282   :  { %vm142_vm7 = vmor %vm140_vm6, %vm141_vm5 }
 0x283   :  { %v137_v29 = vsub.f32 1.0, %v136_v28 }
 0x285   :  { %v138_v31 = vmul.f32 %v172_v27, %v137_v29 }
 0x287   :  { %v139_v33 = vadd.f32 %v172_v27, %v138_v31 }
 0x289   :  { %v143_v35 = vsel %vm142_vm7, %v172_v27, %v139_v33 }
 0x28a   :  { %v148_v36 = vsel %vm145_vm8, %v147_v34, %v143_v35 }
 0x28b   :  { %v149_v37 = vmul.f32 %v170_v25, %v148_v36 }
 0x28d   :  { %150 = vst [vmem:[%s284_s5] sm:$0xff] %v149_v37 }
 0x28e   :  { %155 = vsyncpa [#allocation3], 1 }
 0x28f   :  { %156 = vsyncpa [#allocation5], 1 }

</bundles_post_ra>
